<compile_context>
chip_gen: v6e
topology: v6e:2x2x1
jax: 0.10.0
libtpu: 0.0.40
codegen_flags: <defaults>
</compile_context>

<pallas_src>
import functools

import jax
import jax.numpy as jnp
import numpy as np
from jax.experimental import pallas as pl
from jax.experimental.pallas import tpu as pltpu

_HIDDEN = 1024


def _round_up(x, m):
    return (x + m - 1) // m * m


def _encoder_text_kernel(x_ref, w1_ref, b1_ref, w2_ref, b2_ref,
                         feat_ref, feat_r_ref):
    # x:  (TB, Kp)   bf16   (one batch tile per grid step, pipelined)
    # w1: (Kp, Hp)   bf16   (resident across grid steps)
    # b1: (1, Hp)    f32
    # w2: (Hp, Np)   bf16   (resident across grid steps)
    # b2: (1, Np)    f32
    x = x_ref[...]

    # fc1 + ReLU (MXU matmul, f32 accumulate)
    h = jnp.dot(x, w1_ref[...], preferred_element_type=jnp.float32)
    h = jnp.maximum(h + b1_ref[...], 0.0)

    # fc2 (cast activations back to bf16 for the MXU, accumulate in f32)
    y = jnp.dot(h.astype(w2_ref.dtype), w2_ref[...],
                preferred_element_type=jnp.float32)
    y = y + b2_ref[...]

    feat_ref[...] = y.astype(feat_ref.dtype)
    feat_r_ref[...] = jnp.maximum(y, 0.0).astype(feat_r_ref.dtype)


@functools.partial(jax.jit, static_argnames=("block_b",))
def encoder_text_forward(texts, w1, b1, w2, b2, *, block_b=128):
    """texts: (B, txt_dim) f32. w1: (txt_dim, 1024), w2: (1024, embed).

    Returns (features, features_r), each (B, embed) f32.
    """
    B, txt_dim = texts.shape
    hidden, embed_size = w2.shape

    # --- lane-dense padding (feature dims -> multiples of 128) -------------
    Kp = _round_up(txt_dim, 128)
    Hp = _round_up(hidden, 128)          # 1024 already aligned
    Np = _round_up(embed_size, 128)

    # batch tile: multiple of 16 (bf16 sublane packing), pipelined over grid
    TB = min(block_b, _round_up(B, 16))
    TB = _round_up(TB, 16)
    Bp = _round_up(B, TB)

    bf16 = jnp.bfloat16
    x_p = jnp.zeros((Bp, Kp), bf16).at[:B, :txt_dim].set(texts.astype(bf16))
    w1_p = jnp.zeros((Kp, Hp), bf16).at[:txt_dim, :hidden].set(w1.astype(bf16))
    b1_p = jnp.zeros((1, Hp), jnp.float32).at[:, :hidden].set(
        b1.reshape(1, hidden).astype(jnp.float32))
    w2_p = jnp.zeros((Hp, Np), bf16).at[:hidden, :embed_size].set(w2.astype(bf16))
    b2_p = jnp.zeros((1, Np), jnp.float32).at[:, :embed_size].set(
        b2.reshape(1, embed_size).astype(jnp.float32))

    grid = (pl.cdiv(Bp, TB),)

    # --- VMEM budget: double-buffered x/out tiles + resident weights -------
    vmem_bytes = (
        2 * TB * Kp * 2            # x tile, bf16, double-buffered
        + Kp * Hp * 2 + Hp * Np * 2  # resident weights (bf16)
        + (Hp + Np) * 4            # biases (f32)
        + 2 * 2 * TB * Np * 4      # two f32 output tiles, double-buffered
        + TB * Hp * 4              # f32 hidden activations
    )
    vmem_limit = int(min(max(2 * vmem_bytes, 4 << 20), 32 << 20))

    cost = pl.CostEstimate(
        flops=2 * Bp * (Kp * Hp + Hp * Np),
        bytes_accessed=(x_p.size * 2 + w1_p.size * 2 + w2_p.size * 2
                        + (b1_p.size + b2_p.size) * 4 + 2 * Bp * Np * 4),
        transcendentals=0,
    )

    feat_p, feat_r_p = pl.pallas_call(
        _encoder_text_kernel,
        out_shape=(
            jax.ShapeDtypeStruct((Bp, Np), jnp.float32),
            jax.ShapeDtypeStruct((Bp, Np), jnp.float32),
        ),
        grid=grid,
        in_specs=[
            pl.BlockSpec((TB, Kp), lambda i: (i, 0)),   # x tile (pipelined)
            pl.BlockSpec((Kp, Hp), lambda i: (0, 0)),   # w1 (resident)
            pl.BlockSpec((1, Hp), lambda i: (0, 0)),    # b1 (resident)
            pl.BlockSpec((Hp, Np), lambda i: (0, 0)),   # w2 (resident)
            pl.BlockSpec((1, Np), lambda i: (0, 0)),    # b2 (resident)
        ],
        out_specs=(
            pl.BlockSpec((TB, Np), lambda i: (i, 0)),
            pl.BlockSpec((TB, Np), lambda i: (i, 0)),
        ),
        compiler_params=pltpu.CompilerParams(
            dimension_semantics=("parallel",),
            vmem_limit_bytes=vmem_limit,
        ),
        cost_estimate=cost,
    )(x_p, w1_p, b1_p, w2_p, b2_p)

    # strip batch / lane padding
    return feat_p[:B, :embed_size], feat_r_p[:B, :embed_size]


def init_encoder_text_params(key, txt_dim, embed_size):
    """Deterministic Xavier-uniform init matching the PyTorch init_weights()."""
    hidden = _HIDDEN
    k1, k2 = jax.random.split(key)
    r1 = np.sqrt(6.0) / np.sqrt(txt_dim + hidden)
    r2 = np.sqrt(6.0) / np.sqrt(hidden + embed_size)
    # PyTorch Linear weight is (out, in); store transposed (in, out) for the kernel.
    w1 = jax.random.uniform(k1, (txt_dim, hidden), jnp.float32, -r1, r1)
    b1 = jnp.zeros((1, hidden), jnp.float32)
    w2 = jax.random.uniform(k2, (hidden, embed_size), jnp.float32, -r2, r2)
    b2 = jnp.zeros((1, embed_size), jnp.float32)
    return w1, b1, w2, b2


if __name__ == "__main__":
    key = jax.random.PRNGKey(0)
    k_x, k_p = jax.random.split(key)

    batch = 8
    txt_dim = 32
    embed_size = 32

    texts = jax.random.normal(k_x, (batch, txt_dim), jnp.float32)
    w1, b1, w2, b2 = init_encoder_text_params(k_p, txt_dim, embed_size)

    features, features_r = encoder_text_forward(texts, w1, b1, w2, b2)
    jax.block_until_ready((features, features_r))

    # Reference check in plain JAX (f32). Tolerances loosened because the
    # kernel quantizes inputs/weights to bf16 (accumulation stays f32).
    h_ref = jnp.maximum(texts @ w1 + b1, 0.0)
    feat_ref = h_ref @ w2 + b2
    featr_ref = jnp.maximum(feat_ref, 0.0)
    assert features.shape == (batch, embed_size)
    assert features_r.shape == (batch, embed_size)
    assert jnp.allclose(features, feat_ref, atol=3e-2, rtol=3e-2)
    assert jnp.allclose(features_r, featr_ref, atol=3e-2, rtol=3e-2)

    print("KERNEL_OK")
</pallas_src>

<mosaic_0001>
module attributes {stable_mosaic.version = 11 : i64} {
  func.func @_encoder_text_kernel(%arg0: i32, %arg1: memref<16x128xbf16, #tpu.memory_space<vmem>>, %arg2: memref<128x1024xbf16, #tpu.memory_space<vmem>>, %arg3: memref<1x1024xf32, #tpu.memory_space<vmem>>, %arg4: memref<1024x128xbf16, #tpu.memory_space<vmem>>, %arg5: memref<1x128xf32, #tpu.memory_space<vmem>>, %arg6: memref<16x128xf32, #tpu.memory_space<vmem>>, %arg7: memref<16x128xf32, #tpu.memory_space<vmem>>) attributes {dimension_semantics = [#tpu.dimension_semantics<parallel>], iteration_bounds = array<i64: 1>, scalar_prefetch = 0 : i64, scratch_operands = 0 : i64, tpu.core_type = #tpu.core_type<tc>, window_params = [{transform_indices = @transform_0, window_bounds = array<i64: 16, 128>}, {pipeline_mode = #tpu.pipeline_mode<synchronous>, transform_indices = @transform_1, window_bounds = array<i64: 128, 1024>}, {pipeline_mode = #tpu.pipeline_mode<synchronous>, transform_indices = @transform_2, window_bounds = array<i64: 1, 1024>}, {pipeline_mode = #tpu.pipeline_mode<synchronous>, transform_indices = @transform_3, window_bounds = array<i64: 1024, 128>}, {pipeline_mode = #tpu.pipeline_mode<synchronous>, transform_indices = @transform_4, window_bounds = array<i64: 1, 128>}, {transform_indices = @transform_5, window_bounds = array<i64: 16, 128>}, {transform_indices = @transform_6, window_bounds = array<i64: 16, 128>}]} {
    %c0 = arith.constant 0 : index
    %c0_0 = arith.constant 0 : index
    %0 = vector.load %arg1[%c0, %c0_0] : memref<16x128xbf16, #tpu.memory_space<vmem>>, vector<16x128xbf16>
    %c0_1 = arith.constant 0 : index
    %c0_2 = arith.constant 0 : index
    %1 = vector.load %arg2[%c0_1, %c0_2] : memref<128x1024xbf16, #tpu.memory_space<vmem>>, vector<128x1024xbf16>
    %cst = arith.constant dense<0.000000e+00> : vector<16x1024xf32>
    %2 = tpu.matmul %0, %1, %cst {dimension_numbers = #tpu.dot_dimension_numbers<[1], [0], [0], [1], [0, 0, 1, 1], [], []>} : vector<16x128xbf16>, vector<128x1024xbf16>, vector<16x1024xf32> -> vector<16x1024xf32>
    %c0_3 = arith.constant 0 : index
    %c0_4 = arith.constant 0 : index
    %3 = vector.load %arg3[%c0_3, %c0_4] : memref<1x1024xf32, #tpu.memory_space<vmem>>, vector<1x1024xf32>
    %4 = vector.broadcast %3 : vector<1x1024xf32> to vector<16x1024xf32>
    %5 = arith.addf %2, %4 : vector<16x1024xf32>
    %cst_5 = arith.constant 0.000000e+00 : f32
    %6 = vector.broadcast %cst_5 : f32 to vector<16x1024xf32>
    %7 = arith.maximumf %5, %6 : vector<16x1024xf32>
    %8 = arith.truncf %7 : vector<16x1024xf32> to vector<16x1024xbf16>
    %c0_6 = arith.constant 0 : index
    %c0_7 = arith.constant 0 : index
    %9 = vector.load %arg4[%c0_6, %c0_7] : memref<1024x128xbf16, #tpu.memory_space<vmem>>, vector<1024x128xbf16>
    %cst_8 = arith.constant dense<0.000000e+00> : vector<16x128xf32>
    %10 = tpu.matmul %8, %9, %cst_8 {dimension_numbers = #tpu.dot_dimension_numbers<[1], [0], [0], [1], [0, 0, 1, 1], [], []>} : vector<16x1024xbf16>, vector<1024x128xbf16>, vector<16x128xf32> -> vector<16x128xf32>
    %c0_9 = arith.constant 0 : index
    %c0_10 = arith.constant 0 : index
    %11 = vector.load %arg5[%c0_9, %c0_10] : memref<1x128xf32, #tpu.memory_space<vmem>>, vector<1x128xf32>
    %12 = vector.broadcast %11 : vector<1x128xf32> to vector<16x128xf32>
    %13 = arith.addf %10, %12 : vector<16x128xf32>
    %c0_11 = arith.constant 0 : index
    %c0_12 = arith.constant 0 : index
    %14 = vector.load %arg6[%c0_11, %c0_12] : memref<16x128xf32, #tpu.memory_space<vmem>>, vector<16x128xf32>
    tpu.vector_store %arg6[%c0_11, %c0_12], %13 {strides = array<i32>} : memref<16x128xf32, #tpu.memory_space<vmem>>, vector<16x128xf32>,
    %cst_13 = arith.constant 0.000000e+00 : f32
    %15 = vector.broadcast %cst_13 : f32 to vector<16x128xf32>
    %16 = arith.maximumf %13, %15 : vector<16x128xf32>
    %c0_14 = arith.constant 0 : index
    %c0_15 = arith.constant 0 : index
    %17 = vector.load %arg7[%c0_14, %c0_15] : memref<16x128xf32, #tpu.memory_space<vmem>>, vector<16x128xf32>
    tpu.vector_store %arg7[%c0_14, %c0_15], %16 {strides = array<i32>} : memref<16x128xf32, #tpu.memory_space<vmem>>, vector<16x128xf32>,
    return
  }
  func.func @transform_0(%arg0: i32) -> (i32, i32) {
    %c0_i32 = arith.constant 0 : i32
    %c0_i32_0 = arith.constant 0 : i32
    return %arg0, %c0_i32 : i32, i32
  }
  func.func @transform_1(%arg0: i32) -> (i32, i32) {
    %c0_i32 = arith.constant 0 : i32
    %c0_i32_0 = arith.constant 0 : i32
    %c0_i32_1 = arith.constant 0 : i32
    return %c0_i32, %c0_i32_0 : i32, i32
  }
  func.func @transform_2(%arg0: i32) -> (i32, i32) {
    %c0_i32 = arith.constant 0 : i32
    %c0_i32_0 = arith.constant 0 : i32
    %c0_i32_1 = arith.constant 0 : i32
    return %c0_i32, %c0_i32_0 : i32, i32
  }
  func.func @transform_3(%arg0: i32) -> (i32, i32) {
    %c0_i32 = arith.constant 0 : i32
    %c0_i32_0 = arith.constant 0 : i32
    %c0_i32_1 = arith.constant 0 : i32
    return %c0_i32, %c0_i32_0 : i32, i32
  }
  func.func @transform_4(%arg0: i32) -> (i32, i32) {
    %c0_i32 = arith.constant 0 : i32
    %c0_i32_0 = arith.constant 0 : i32
    %c0_i32_1 = arith.constant 0 : i32
    return %c0_i32, %c0_i32_0 : i32, i32
  }
  func.func @transform_5(%arg0: i32) -> (i32, i32) {
    %c0_i32 = arith.constant 0 : i32
    %c0_i32_0 = arith.constant 0 : i32
    return %arg0, %c0_i32 : i32, i32
  }
  func.func @transform_6(%arg0: i32) -> (i32, i32) {
    %c0_i32 = arith.constant 0 : i32
    %c0_i32_0 = arith.constant 0 : i32
    return %arg0, %c0_i32 : i32, i32
  }
}

</mosaic_0001>

<bundles_post_ra>
// kernel: encoder_text_forward.1
= control target key start
LH: loop header
LB: loop body
LE: loop exit
PB: predicated region body
PF: predicated region fallthrough
CT: control target
= control target key end

     0   :  { %v1634_v3 = vmov 0   ;;  %s2105_s1 = inlined_call_operand.vmem [shape: bf16[128,1024], index: 1, kind: input, shape index: {}]   ;;  %s2106_s0 = inlined_call_operand.vmem [shape: bf16[16,128], index: 0, kind: input, shape index: {}]   ;;  %s2107_s3 = inlined_call_operand.vmem [shape: bf16[1024,128], index: 3, kind: input, shape index: {}]   ;;  %s2108_s2 = inlined_call_operand.vmem [shape: f32[1,1024], index: 2, kind: input, shape index: {}]   ;;  %s2109_s4 = inlined_call_operand.vmem [shape: f32[1,128], index: 4, kind: input, shape index: {}]   ;;  %s2110_s5 = inlined_call_operand.vmem [shape: f32[16,128], index: 5, kind: output, shape index: {0}]   ;;  %s2111_s6 = inlined_call_operand.vmem [shape: f32[16,128], index: 6, kind: output, shape index: {1}]  }
   0x1   :  { %v81_v0 = vld [vmem:[%s2105_s1 + $0x1c0] sm:$0xff]  ;;  %v82_v2 = vld [vmem:[%s2105_s1 + $0x1c8] sm:$0xff]  ;;  %489 = vmatprep.mubr.bf16.mxu0 %v1634_v3  ;;  %532 = vmatprep.mubr.bf16.mxu1 %v1634_v3  ;;  %v83_v60 = vld [vmem:[%s2105_s1 + $0x1d0] sm:$0xff] }
   0x2   :  { %v85_v1 = vld [vmem:[%s2105_s1 + $0x1e0] sm:$0xff]  ;;  %v86_v5 = vld [vmem:[%s2105_s1 + $0x1e8] sm:$0xff]  ;;  %v87_v63 = vld [vmem:[%s2105_s1 + $0x1f0] sm:$0xff] }
   0x3   :  { %v1408_v4 = vcombine.high %v81_v0, %v85_v1  ;;  %v1407_v6 = vcombine.low %v81_v0, %v85_v1  ;;  %v73_v7 = vld [vmem:[%s2105_s1 + $0x180] sm:$0xff]  ;;  %v1410_v9 = vcombine.high %v82_v2, %v86_v5  ;;  %v1409_v10 = vcombine.low %v82_v2, %v86_v5  ;;  %v74_v12 = vld [vmem:[%s2105_s1 + $0x188] sm:$0xff]  ;;  %v84_v1 = vld [vmem:[%s2105_s1 + $0x1d8] sm:$0xff] }
   0x4   :  { %v77_v8 = vld [vmem:[%s2105_s1 + $0x1a0] sm:$0xff]  ;;  %v78_v13 = vld [vmem:[%s2105_s1 + $0x1a8] sm:$0xff]  ;;  %v88_v2 = vld [vmem:[%s2105_s1 + $0x1f8] sm:$0xff] }
   0x5   :  { %v1400_v11 = vcombine.high %v73_v7, %v77_v8  ;;  %v65_v14 = vld [vmem:[%s2105_s1 + $0x140] sm:$0xff]  ;;  %457 = vmatprep.subr.bf16.mxu0 %v1408_v4  ;;  %v1402_v15 = vcombine.high %v74_v12, %v78_v13  ;;  %v66_v17 = vld [vmem:[%s2105_s1 + $0x148] sm:$0xff]  ;;  %500 = vmatprep.subr.bf16.mxu1 %v1410_v9  ;;  %v1399_v19 = vcombine.low %v73_v7, %v77_v8  ;;  %v75_v5 = vld [vmem:[%s2105_s1 + $0x190] sm:$0xff] }
   0x6   :  { %v69_v16 = vld [vmem:[%s2105_s1 + $0x160] sm:$0xff]  ;;  %v70_v18 = vld [vmem:[%s2105_s1 + $0x168] sm:$0xff]  ;;  %458 = vmatpush1.bf16.msra.mxu0 %v1407_v6  ;;  %501 = vmatpush1.bf16.msra.mxu1 %v1409_v10  ;;  %v1401_v20 = vcombine.low %v74_v12, %v78_v13  ;;  %v1412_v8 = vcombine.high %v83_v60, %v87_v63  ;;  %v79_v9 = vld [vmem:[%s2105_s1 + $0x1b0] sm:$0xff]  ;;  %v1414_v10 = vcombine.high %v84_v1, %v88_v2 }
   0x7   :  { %459 = vmatprep.subr.bf16.mxu0 %v1400_v11  ;;  %v1392_v21 = vcombine.high %v65_v14, %v69_v16  ;;  %502 = vmatprep.subr.bf16.mxu1 %v1402_v15  ;;  %v1394_v22 = vcombine.high %v66_v17, %v70_v18  ;;  %v57_v23 = vld [vmem:[%s2105_s1 + $0x100] sm:$0xff]  ;;  %v58_v25 = vld [vmem:[%s2105_s1 + $0x108] sm:$0xff]  ;;  %v1391_v27 = vcombine.low %v65_v14, %v69_v16  ;;  %v76_v11 = vld [vmem:[%s2105_s1 + $0x198] sm:$0xff] }
   0x8   :  { %v61_v24 = vld [vmem:[%s2105_s1 + $0x120] sm:$0xff]  ;;  %v62_v26 = vld [vmem:[%s2105_s1 + $0x128] sm:$0xff]  ;;  %v1393_v28 = vcombine.low %v66_v17, %v70_v18  ;;  %v80_v12 = vld [vmem:[%s2105_s1 + $0x1b8] sm:$0xff]  ;;  %v1411_v13 = vcombine.low %v83_v60, %v87_v63  ;;  %v1413_v15 = vcombine.low %v84_v1, %v88_v2  ;;  %v1404_v16 = vcombine.high %v75_v5, %v79_v9 }
   0x9   :  { %v1384_v29 = vcombine.high %v57_v23, %v61_v24  ;;  %v1386_v30 = vcombine.high %v58_v25, %v62_v26  ;;  %v49_v31 = vld [vmem:[%s2105_s1 + $0xc0] sm:$0xff]  ;;  %v50_v33 = vld [vmem:[%s2105_s1 + $0xc8] sm:$0xff]  ;;  %v1383_v35 = vcombine.low %v57_v23, %v61_v24  ;;  %v1385_v36 = vcombine.low %v58_v25, %v62_v26  ;;  %v67_v14 = vld [vmem:[%s2105_s1 + $0x150] sm:$0xff] }
   0xa   :  { %460 = vmatpush1.bf16.msra.mxu0 %v1399_v19  ;;  %503 = vmatpush1.bf16.msra.mxu1 %v1401_v20  ;;  %v53_v32 = vld [vmem:[%s2105_s1 + $0xe0] sm:$0xff]  ;;  %v54_v34 = vld [vmem:[%s2105_s1 + $0xe8] sm:$0xff]  ;;  %v71_v17 = vld [vmem:[%s2105_s1 + $0x170] sm:$0xff]  ;;  %v1406_v18 = vcombine.high %v76_v11, %v80_v12  ;;  %v1405_v23 = vcombine.low %v76_v11, %v80_v12 }
   0xb   :  { %461 = vmatprep.subr.bf16.mxu0 %v1392_v21  ;;  %504 = vmatprep.subr.bf16.mxu1 %v1394_v22  ;;  %v1376_v37 = vcombine.high %v49_v31, %v53_v32  ;;  %v1378_v38 = vcombine.high %v50_v33, %v54_v34  ;;  %v41_v39 = vld [vmem:[%s2105_s1 + $0x80] sm:$0xff]  ;;  %v42_v41 = vld [vmem:[%s2105_s1 + $0x88] sm:$0xff]  ;;  %v1375_v43 = vcombine.low %v49_v31, %v53_v32  ;;  %v68_v19 = vld [vmem:[%s2105_s1 + $0x158] sm:$0xff] }
   0xc   :  { %v45_v40 = vld [vmem:[%s2105_s1 + $0xa0] sm:$0xff]  ;;  %v46_v42 = vld [vmem:[%s2105_s1 + $0xa8] sm:$0xff]  ;;  %v1377_v44 = vcombine.low %v50_v33, %v54_v34  ;;  %v72_v20 = vld [vmem:[%s2105_s1 + $0x178] sm:$0xff]  ;;  %v1403_v21 = vcombine.low %v75_v5, %v79_v9  ;;  %v1396_v24 = vcombine.high %v67_v14, %v71_v17 }
   0xd   :  { %v1368_v45 = vcombine.high %v41_v39, %v45_v40  ;;  %v1370_v46 = vcombine.high %v42_v41, %v46_v42  ;;  %v33_v47 = vld [vmem:[%s2105_s1 + $0x40] sm:$0xff]  ;;  %v34_v49 = vld [vmem:[%s2105_s1 + $0x48] sm:$0xff]  ;;  %v1367_v51 = vcombine.low %v41_v39, %v45_v40  ;;  %v1369_v52 = vcombine.low %v42_v41, %v46_v42  ;;  %v59_v22 = vld [vmem:[%s2105_s1 + $0x110] sm:$0xff] }
   0xe   :  { %462 = vmatpush1.bf16.msra.mxu0 %v1391_v27  ;;  %505 = vmatpush1.bf16.msra.mxu1 %v1393_v28  ;;  %v37_v48 = vld [vmem:[%s2105_s1 + $0x60] sm:$0xff]  ;;  %v38_v50 = vld [vmem:[%s2105_s1 + $0x68] sm:$0xff]  ;;  %v63_v25 = vld [vmem:[%s2105_s1 + $0x130] sm:$0xff]  ;;  %v1398_v26 = vcombine.high %v68_v19, %v72_v20  ;;  %v1397_v31 = vcombine.low %v68_v19, %v72_v20 }
   0xf   :  { %463 = vmatprep.subr.bf16.mxu0 %v1384_v29  ;;  %506 = vmatprep.subr.bf16.mxu1 %v1386_v30  ;;  %v1360_v53 = vcombine.high %v33_v47, %v37_v48  ;;  %v25_v54 = vld [vmem:[%s2105_s1] sm:$0xff]  ;;  %v1362_v56 = vcombine.high %v34_v49, %v38_v50  ;;  %v26_v57 = vld [vmem:[%s2105_s1 + $0x8] sm:$0xff]  ;;  %v1359_v59 = vcombine.low %v33_v47, %v37_v48  ;;  %v60_v27 = vld [vmem:[%s2105_s1 + $0x118] sm:$0xff] }
  0x10   :  { %v29_v55 = vld [vmem:[%s2105_s1 + $0x20] sm:$0xff]  ;;  %v30_v58 = vld [vmem:[%s2105_s1 + $0x28] sm:$0xff]  ;;  %v1361_v61 = vcombine.low %v34_v49, %v38_v50  ;;  %v64_v28 = vld [vmem:[%s2105_s1 + $0x138] sm:$0xff]  ;;  %v1395_v29 = vcombine.low %v67_v14, %v71_v17  ;;  %v1388_v32 = vcombine.high %v59_v22, %v63_v25 }
  0x11   :  { %v1352_v62 = vcombine.high %v25_v54, %v29_v55  ;;  %v1354_v0 = vcombine.high %v26_v57, %v30_v58  ;;  %v1351_v4 = vcombine.low %v25_v54, %v29_v55  ;;  %v1353_v6 = vcombine.low %v26_v57, %v30_v58  ;;  %v1786_v7 = vld [vmem:[%s2106_s0] sm:$0xff]   ;;  %v51_v30 = vld [vmem:[%s2105_s1 + $0xd0] sm:$0xff]  ;;  %v44_v41 = vld [vmem:[%s2105_s1 + $0x98] sm:$0xff] }
  0x12   :  { %464 = vmatpush1.bf16.msra.mxu0 %v1383_v35  ;;  %507 = vmatpush1.bf16.msra.mxu1 %v1385_v36  ;;  %v55_v33 = vld [vmem:[%s2105_s1 + $0xf0] sm:$0xff]  ;;  %v1390_v34 = vcombine.high %v60_v27, %v64_v28  ;;  %v56_v35 = vld [vmem:[%s2105_s1 + $0xf8] sm:$0xff]  ;;  %v1387_v36 = vcombine.low %v59_v22, %v63_v25  ;;  %v1389_v39 = vcombine.low %v60_v27, %v64_v28  ;;  %v1578_v12 = vld [vmem:[%s2107_s3 + $0x68] sm:$0xff]  }
  0x13   :  { %465 = vmatprep.subr.bf16.mxu0 %v1376_v37  ;;  %508 = vmatprep.subr.bf16.mxu1 %v1378_v38  ;;  %v43_v37 = vld [vmem:[%s2105_s1 + $0x90] sm:$0xff]  ;;  %v1380_v40 = vcombine.high %v51_v30, %v55_v33  ;;  %v48_v42 = vld [vmem:[%s2105_s1 + $0xb8] sm:$0xff]  ;;  %v1580_v14 = vld [vmem:[%s2107_s3 + $0x28] sm:$0xff]  }
  0x14   :  { %v47_v38 = vld [vmem:[%s2105_s1 + $0xb0] sm:$0xff]  ;;  %v36_v49 = vld [vmem:[%s2105_s1 + $0x58] sm:$0xff]  ;;  %v1373_v55 = vcombine.low %v44_v41, %v48_v42  ;;  %v1584_v17 = vld [vmem:[%s2107_s3 + $0x20] sm:$0xff]  }
  0x15   :  { %v1372_v48 = vcombine.high %v43_v37, %v47_v38  ;;  %v40_v50 = vld [vmem:[%s2105_s1 + $0x78] sm:$0xff]  ;;  %v31_v54 = vld [vmem:[%s2105_s1 + $0x30] sm:$0xff]  ;;  %v1594_v27 = vld [vmem:[%s2107_s3 + $0x48] sm:$0xff]  }
  0x16   :  { %466 = vmatpush1.bf16.msra.mxu0 %v1375_v43  ;;  %509 = vmatpush1.bf16.msra.mxu1 %v1377_v44  ;;  %v1379_v44 = vcombine.low %v51_v30, %v55_v33  ;;  %v28_v57 = vld [vmem:[%s2105_s1 + $0x18] sm:$0xff]  ;;  %v1575_v9 = vld [vmem:[%s2107_s3 + $0xf0] sm:$0xff]   ;;  %v1595_v28 = vld [vmem:[%s2107_s3 + $0xc8] sm:$0xff]  }
  0x17   :  { %467 = vmatprep.subr.bf16.mxu0 %v1368_v45  ;;  %510 = vmatprep.subr.bf16.mxu1 %v1370_v46  ;;  %v35_v45 = vld [vmem:[%s2105_s1 + $0x50] sm:$0xff]  ;;  %v32_v58 = vld [vmem:[%s2105_s1 + $0x38] sm:$0xff]  ;;  %v1597_v30 = vld [vmem:[%s2107_s3 + $0x88] sm:$0xff]  }
  0x18   :  { %v39_v46 = vld [vmem:[%s2105_s1 + $0x70] sm:$0xff]  ;;  %v1358_v63 = vcombine.high %v28_v57, %v32_v58  ;;  %v1571_v2 = vld [vmem:[%s2107_s3 + $0xf8] sm:$0xff]   ;;  %v1600_v33 = vld [vmem:[%s2107_s3] sm:$0xff]  }
  0x19   :  { %v1363_v60 = vcombine.low %v35_v45, %v39_v46  ;;  %v1572_v5 = vld [vmem:[%s2107_s3 + $0x38] sm:$0xff]   ;;  %v1577_v11 = vld [vmem:[%s2107_s3 + $0xb0] sm:$0xff]  }
  0x1a   :  { %468 = vmatpush1.bf16.msra.mxu0 %v1367_v51  ;;  %511 = vmatpush1.bf16.msra.mxu1 %v1369_v52  ;;  %v1374_v51 = vcombine.high %v44_v41, %v48_v42  ;;  %v1371_v52 = vcombine.low %v43_v37, %v47_v38  ;;  %v1586_v19 = vld [vmem:[%s2107_s3 + $0x58] sm:$0xff]   ;;  %v1592_v25 = vld [vmem:[%s2107_s3 + $0x10] sm:$0xff]  }
  0x1b   :  { %469 = vmatprep.subr.bf16.mxu0 %v1360_v53  ;;  %512 = vmatprep.subr.bf16.mxu1 %v1362_v56  ;;  %v27_v53 = vld [vmem:[%s2105_s1 + $0x10] sm:$0xff]  ;;  %v1364_v56 = vcombine.high %v35_v45, %v39_v46  ;;  %v1587_v20 = vld [vmem:[%s2107_s3 + $0xd8] sm:$0xff]  }
  0x1c   :  { %v1355_v1 = vcombine.low %v27_v53, %v31_v54  ;;  %v1589_v22 = vld [vmem:[%s2107_s3 + $0x98] sm:$0xff]  }
  0x1e   :  { %470 = vmatpush1.bf16.msra.mxu0 %v1359_v59  ;;  %513 = vmatpush1.bf16.msra.mxu1 %v1361_v61  ;;  %v1366_v59 = vcombine.high %v36_v49, %v40_v50  ;;  %v1365_v61 = vcombine.low %v36_v49, %v40_v50 }
  0x1f   :  { %471 = vmatprep.subr.bf16.mxu0 %v1352_v62  ;;  %514 = vmatprep.subr.bf16.mxu1 %v1354_v0  ;;  %v1356_v62 = vcombine.high %v27_v53, %v31_v54  ;;  %v1570_v0 = vld [vmem:[%s2107_s3 + $0x78] sm:$0xff]  }
  0x22   :  { %472 = vmatpush1.bf16.msra.mxu0 %v1351_v4  ;;  %515 = vmatpush1.bf16.msra.mxu1 %v1353_v6  ;;  %v1357_v4 = vcombine.low %v28_v57, %v32_v58  ;;  %v1573_v6 = vld [vmem:[%s2107_s3 + $0xb8] sm:$0xff]  }
  0x23   :  { %543 = vmatprep.subr.bf16.mxu0 %v1412_v8  ;;  %586 = vmatprep.subr.bf16.mxu1 %v1414_v10  ;;  %v1574_v8 = vld [vmem:[%s2107_s3 + $0x70] sm:$0xff]  }
  0x24   :  { %v1576_v10 = vld [vmem:[%s2107_s3 + $0x30] sm:$0xff]  }
  0x25   :  { %490 = vmatmul.mubr.bf16.vlgmr.msra.gmra.mxu0 %v1786_v7  ;;  %533 = vmatmul.mubr.bf16.vlgmr.msra.gmra.mxu1 %v1786_v7 }
  0x26   :  { %544 = vmatpush1.bf16.msra.mxu0 %v1411_v13  ;;  %587 = vmatpush1.bf16.msra.mxu1 %v1413_v15  ;;  %v1579_v13 = vld [vmem:[%s2107_s3 + $0xe8] sm:$0xff]  }
  0x27   :  { %545 = vmatprep.subr.bf16.mxu0 %v1404_v16  ;;  %588 = vmatprep.subr.bf16.mxu1 %v1406_v18  ;;  %v1581_v15 = vld [vmem:[%s2107_s3 + $0xa8] sm:$0xff]   ;;  %v1583_v16 = vld [vmem:[%s2107_s3 + $0xe0] sm:$0xff]  }
  0x28   :  { %575 = vmatprep.mubr.bf16.mxu0 %v1634_v3  ;;  %618 = vmatprep.mubr.bf16.mxu1 %v1634_v3  ;;  %v52_v3 = vld [vmem:[%s2105_s1 + $0xd8] sm:$0xff]  ;;  %v1585_v18 = vld [vmem:[%s2107_s3 + $0xa0] sm:$0xff]  }
  0x29   :  { %v1382_v43 = vcombine.high %v52_v3, %v56_v35  ;;  %v1381_v47 = vcombine.low %v52_v3, %v56_v35  ;;  %v1602_v3 = vld [vmem:[%s2107_s3 + $0x178] sm:$0xff]  }
  0x2a   :  { %546 = vmatpush1.bf16.msra.mxu0 %v1403_v21  ;;  %589 = vmatpush1.bf16.msra.mxu1 %v1405_v23  ;;  %v1588_v21 = vld [vmem:[%s2107_s3 + $0x18] sm:$0xff]   ;;  %v1590_v23 = vld [vmem:[%s2107_s3 + $0x50] sm:$0xff]  }
  0x2b   :  { %547 = vmatprep.subr.bf16.mxu0 %v1396_v24  ;;  %590 = vmatprep.subr.bf16.mxu1 %v1398_v26  ;;  %v1591_v24 = vld [vmem:[%s2107_s3 + $0xd0] sm:$0xff]   ;;  %v1603_v35 = vld [vmem:[%s2107_s3 + $0x1f8] sm:$0xff]  }
  0x2c   :  { %v1593_v26 = vld [vmem:[%s2107_s3 + $0x90] sm:$0xff]  }
  0x2e   :  { %548 = vmatpush1.bf16.msra.mxu0 %v1395_v29  ;;  %591 = vmatpush1.bf16.msra.mxu1 %v1397_v31  ;;  %v1596_v29 = vld [vmem:[%s2107_s3 + $0x8] sm:$0xff]   ;;  %v1598_v31 = vld [vmem:[%s2107_s3 + $0x40] sm:$0xff]  }
  0x2f   :  { %549 = vmatprep.subr.bf16.mxu0 %v1388_v32  ;;  %592 = vmatprep.subr.bf16.mxu1 %v1390_v34  ;;  %v1599_v32 = vld [vmem:[%s2107_s3 + $0xc0] sm:$0xff]  }
  0x30   :  { %v1601_v34 = vld [vmem:[%s2107_s3 + $0x80] sm:$0xff]  }
  0x32   :  { %550 = vmatpush1.bf16.msra.mxu0 %v1387_v36  ;;  %593 = vmatpush1.bf16.msra.mxu1 %v1389_v39  ;;  %v91_v36 = vlaneseq }
  0x33   :  { %551 = vmatprep.subr.bf16.mxu0 %v1380_v40  ;;  %594 = vmatprep.subr.bf16.mxu1 %v1382_v43  ;;  %v1984_v40 = vld [vmem:[%s2108_s2] sm:$0xff] }
  0x34   :  { %v1977_v37 = vshrl.u32 %v91_v36, 7 }
  0x36   :  { %552 = vmatpush1.bf16.msra.mxu0 %v1379_v44  ;;  %595 = vmatpush1.bf16.msra.mxu1 %v1381_v47  ;;  %v101_v38 = vsub.s32 2, %v1977_v37  ;;  %v97_v39 = vsub.s32 1, %v1977_v37  ;;  %v93_v41 = vsub.s32 0, %v1977_v37  ;;  %v105_v42 = vsub.s32 3, %v1977_v37 }
  0x37   :  { %553 = vmatprep.subr.bf16.mxu0 %v1372_v48  ;;  %596 = vmatprep.subr.bf16.mxu1 %v1374_v51 }
  0x38   :  { %v102_v44 = vrot.slane %v1984_v40, %v101_v38  ;;  %v98_v46 = vrot.slane %v1984_v40, %v97_v39  ;;  %v94_v47 = vrot.slane %v1984_v40, %v93_v41  ;;  %v106_v49 = vrot.slane %v1984_v40, %v105_v42  ;;  %v1625_v38 = vld [vmem:[%s2107_s3 + $0x190] sm:$0xff]   ;;  %v1626_v39 = vld [vmem:[%s2107_s3 + $0x148] sm:$0xff]  }
  0x3a   :  { %554 = vmatpush1.bf16.msra.mxu0 %v1371_v52  ;;  %597 = vmatpush1.bf16.msra.mxu1 %v1373_v55 }
  0x3b   :  { %555 = vmatprep.subr.bf16.mxu0 %v1364_v56  ;;  %598 = vmatprep.subr.bf16.mxu1 %v1366_v59 }
  0x3e   :  { %556 = vmatpush1.bf16.msra.mxu0 %v1363_v60  ;;  %599 = vmatpush1.bf16.msra.mxu1 %v1365_v61 }
  0x3f   :  { %557 = vmatprep.subr.bf16.mxu0 %v1356_v62  ;;  %600 = vmatprep.subr.bf16.mxu1 %v1358_v63 }
  0x42   :  { %558 = vmatpush1.bf16.msra.mxu0 %v1355_v1  ;;  %601 = vmatpush1.bf16.msra.mxu1 %v1357_v4 }
  0x43   :  { %1480 = vmatprep.subr.bf16.mxu0 %v1570_v0  ;;  %1502 = vmatprep.subr.bf16.mxu1 %v1571_v2 }
  0x45   :  { %576 = vmatmul.mubr.bf16.vlgmr.msra.gmra.mxu0 %v1786_v7  ;;  %619 = vmatmul.mubr.bf16.vlgmr.msra.gmra.mxu1 %v1786_v7  ;;  %v1582_v7 = vld [vmem:[%s2107_s3 + $0x60] sm:$0xff]  }
  0x46   :  { %1481 = vmatpush3.bf16.msra.mxu0 %v1572_v5  ;;  %1503 = vmatpush3.bf16.msra.mxu1 %v1573_v6 }
  0x47   :  { %1482 = vmatprep.subr.bf16.mxu0 %v1574_v8  ;;  %1504 = vmatprep.subr.bf16.mxu1 %v1575_v9 }
  0x4a   :  { %1483 = vmatpush3.bf16.msra.mxu0 %v1576_v10  ;;  %1505 = vmatpush3.bf16.msra.mxu1 %v1577_v11  ;;  %v1604_v10 = vld [vmem:[%s2107_s3 + $0x138] sm:$0xff]  }
  0x4b   :  { %1484 = vmatprep.subr.bf16.mxu0 %v1578_v12  ;;  %1506 = vmatprep.subr.bf16.mxu1 %v1579_v13  ;;  %v1605_v13 = vld [vmem:[%s2107_s3 + $0x1b8] sm:$0xff]  }
  0x4e   :  { %1485 = vmatpush3.bf16.msra.mxu0 %v1580_v14  ;;  %1507 = vmatpush3.bf16.msra.mxu1 %v1581_v15  ;;  %v1606_v14 = vld [vmem:[%s2107_s3 + $0x170] sm:$0xff]  }
  0x4f   :  { %1486 = vmatprep.subr.bf16.mxu0 %v1582_v7  ;;  %1508 = vmatprep.subr.bf16.mxu1 %v1583_v16  ;;  %v1607_v7 = vld [vmem:[%s2107_s3 + $0x1f0] sm:$0xff]  }
  0x50   :  { %v1608_v16 = vld [vmem:[%s2107_s3 + $0x130] sm:$0xff]  }
  0x52   :  { %1487 = vmatpush3.bf16.msra.mxu0 %v1584_v17  ;;  %1509 = vmatpush3.bf16.msra.mxu1 %v1585_v18  ;;  %v1609_v17 = vld [vmem:[%s2107_s3 + $0x1b0] sm:$0xff]   ;;  %v1610_v18 = vld [vmem:[%s2107_s3 + $0x168] sm:$0xff]  }
  0x53   :  { %1488 = vmatprep.subr.bf16.mxu0 %v1586_v19  ;;  %1510 = vmatprep.subr.bf16.mxu1 %v1587_v20  ;;  %v1611_v19 = vld [vmem:[%s2107_s3 + $0x1e8] sm:$0xff]  }
  0x54   :  { %v1612_v20 = vld [vmem:[%s2107_s3 + $0x128] sm:$0xff]  }
  0x56   :  { %1489 = vmatpush3.bf16.msra.mxu0 %v1588_v21  ;;  %1511 = vmatpush3.bf16.msra.mxu1 %v1589_v22  ;;  %v1613_v21 = vld [vmem:[%s2107_s3 + $0x1a8] sm:$0xff]   ;;  %v1614_v22 = vld [vmem:[%s2107_s3 + $0x160] sm:$0xff]  }
  0x57   :  { %1490 = vmatprep.subr.bf16.mxu0 %v1590_v23  ;;  %1512 = vmatprep.subr.bf16.mxu1 %v1591_v24  ;;  %v1615_v23 = vld [vmem:[%s2107_s3 + $0x1e0] sm:$0xff]  }
  0x58   :  { %v1616_v24 = vld [vmem:[%s2107_s3 + $0x120] sm:$0xff]  }
  0x5a   :  { %1491 = vmatpush3.bf16.msra.mxu0 %v1592_v25  ;;  %1513 = vmatpush3.bf16.msra.mxu1 %v1593_v26  ;;  %v1617_v25 = vld [vmem:[%s2107_s3 + $0x1a0] sm:$0xff]   ;;  %v1618_v26 = vld [vmem:[%s2107_s3 + $0x158] sm:$0xff]  }
  0x5b   :  { %1492 = vmatprep.subr.bf16.mxu0 %v1594_v27  ;;  %1514 = vmatprep.subr.bf16.mxu1 %v1595_v28  ;;  %v1619_v27 = vld [vmem:[%s2107_s3 + $0x1d8] sm:$0xff]  }
  0x5c   :  { %v1620_v28 = vld [vmem:[%s2107_s3 + $0x118] sm:$0xff]  }
  0x5e   :  { %1493 = vmatpush3.bf16.msra.mxu0 %v1596_v29  ;;  %1515 = vmatpush3.bf16.msra.mxu1 %v1597_v30  ;;  %v1621_v29 = vld [vmem:[%s2107_s3 + $0x198] sm:$0xff]   ;;  %v1622_v30 = vld [vmem:[%s2107_s3 + $0x150] sm:$0xff]  }
  0x5f   :  { %1494 = vmatprep.subr.bf16.mxu0 %v1598_v31  ;;  %1516 = vmatprep.subr.bf16.mxu1 %v1599_v32  ;;  %v113_v31 = vsub.s32 5, %v1977_v37  ;;  %v1623_v32 = vld [vmem:[%s2107_s3 + $0x1d0] sm:$0xff]  }
  0x61   :  { %v114_v42 = vrot.slane %v1984_v40, %v113_v31 }
  0x62   :  { %1495 = vmatpush3.bf16.msra.mxu0 %v1600_v33  ;;  %1517 = vmatpush3.bf16.msra.mxu1 %v1601_v34  ;;  %v109_v33 = vsub.s32 4, %v1977_v37  ;;  %v121_v34 = vsub.s32 7, %v1977_v37 }
  0x63   :  { %1524 = vmatprep.subr.bf16.mxu0 %v1602_v3  ;;  %1546 = vmatprep.subr.bf16.mxu1 %v1603_v35  ;;  %v117_v3 = vsub.s32 6, %v1977_v37  ;;  %v1624_v35 = vld [vmem:[%s2107_s3 + $0x110] sm:$0xff]   ;;  %v1627_v37 = vld [vmem:[%s2107_s3 + $0x1c8] sm:$0xff]  }
  0xe5   :  { %v491_v43 = vpop.f32.mrf.mxu0  ;;  %v534_v45 = vpop.f32.mrf.mxu1 }
  0xe6   :  { %v535_v52 = vadd.f32 %v534_v45, %v102_v44  ;;  %v492_v56 = vadd.f32 %v491_v43, %v94_v47  ;;  %v110_v43 = vrot.slane %v1984_v40, %v109_v33  ;;  %v122_v45 = vrot.slane %v1984_v40, %v121_v34 }
  0xe7   :  { %v493_v48 = vpop.f32.mrf.mxu0  ;;  %v536_v50 = vpop.f32.mrf.mxu1 }
  0xe8   :  { %v494_v53 = vadd.f32 %v493_v48, %v98_v46  ;;  %v537_v57 = vadd.f32 %v536_v50, %v106_v49  ;;  %v631_v0 = vmax.f32 %v535_v52, 0.0  ;;  %v629_v5 = vmax.f32 %v492_v56, 0.0  ;;  %v1628_v48 = vld [vmem:[%s2107_s3 + $0x108] sm:$0xff]  }
  0xe9   :  { %v495_v51 = vpop.f32.mrf.mxu0  ;;  %v538_v55 = vpop.f32.mrf.mxu1  ;;  %v1629_v50 = vld [vmem:[%s2107_s3 + $0x188] sm:$0xff]  }
  0xea   :  { %v496_v54 = vadd.f32 %v495_v51, %v94_v47  ;;  %v539_v58 = vadd.f32 %v538_v55, %v102_v44  ;;  %v630_v1 = vmax.f32 %v494_v53, 0.0  ;;  %v632_v6 = vmax.f32 %v537_v57, 0.0  ;;  %v1630_v51 = vld [vmem:[%s2107_s3 + $0x140] sm:$0xff]  }
  0xeb   :  { %v497_v59 = vpop.f32.mrf.mxu0  ;;  %v540_v61 = vpop.f32.mrf.mxu1 }
  0xec   :  { %v498_v60 = vadd.f32 %v497_v59, %v98_v46  ;;  %v637_v62 = vmax.f32 %v496_v54, 0.0  ;;  %v541_v63 = vadd.f32 %v540_v61, %v106_v49  ;;  %v639_v2 = vmax.f32 %v539_v58, 0.0  ;;  %v1631_v54 = vld [vmem:[%s2107_s3 + $0x1c0] sm:$0xff]  }
  0xed   :  { %v118_v46 = vrot.slane %v1984_v40, %v117_v3 }
  0xee   :  { %v638_v4 = vmax.f32 %v498_v60, 0.0  ;;  %v640_v8 = vmax.f32 %v541_v63, 0.0  ;;  %v645_v11 = vpack.c.bf16 %v637_v62, %v629_v5  ;;  %v647_v15 = vpack.c.bf16 %v639_v2, %v631_v0  ;;  %v1632_v62 = vld [vmem:[%s2107_s3 + $0x100] sm:$0xff]  }
  0xf0   :  { %v646_v9 = vpack.c.bf16 %v638_v4, %v630_v1  ;;  %v648_v12 = vpack.c.bf16 %v640_v8, %v632_v6  ;;  %v1633_v1 = vld [vmem:[%s2107_s3 + $0x180] sm:$0xff]  }
  0xf2   :  { %1204 = vmatprep.mubr.bf16.mxu0 %v646_v9  ;;  %1245 = vmatprep.mubr.bf16.mxu1 %v648_v12 }
  0xf3   :  { %1205 = vmatmul.mubr.bf16.vlgmr.msra.gmra.mxu0 %v645_v11  ;;  %1246 = vmatmul.mubr.bf16.vlgmr.msra.gmra.mxu1 %v647_v15 }
  0xf4   :  { %1525 = vmatpush3.bf16.msra.mxu0 %v1604_v10  ;;  %1547 = vmatpush3.bf16.msra.mxu1 %v1605_v13 }
  0xf5   :  { %1526 = vmatprep.subr.bf16.mxu0 %v1606_v14  ;;  %1548 = vmatprep.subr.bf16.mxu1 %v1607_v7 }
  0xf8   :  { %1527 = vmatpush3.bf16.msra.mxu0 %v1608_v16  ;;  %1549 = vmatpush3.bf16.msra.mxu1 %v1609_v17 }
  0xf9   :  { %1528 = vmatprep.subr.bf16.mxu0 %v1610_v18  ;;  %1550 = vmatprep.subr.bf16.mxu1 %v1611_v19 }
  0xfc   :  { %1529 = vmatpush3.bf16.msra.mxu0 %v1612_v20  ;;  %1551 = vmatpush3.bf16.msra.mxu1 %v1613_v21  ;;  %v1415_v21 = vld [vmem:[%s2109_s4] ss:$0 sm:$0xff] }
  0xfd   :  { %1530 = vmatprep.subr.bf16.mxu0 %v1614_v22  ;;  %1552 = vmatprep.subr.bf16.mxu1 %v1615_v23 }
 0x100   :  { %1531 = vmatpush3.bf16.msra.mxu0 %v1616_v24  ;;  %1553 = vmatpush3.bf16.msra.mxu1 %v1617_v25 }
 0x101   :  { %1532 = vmatprep.subr.bf16.mxu0 %v1618_v26  ;;  %1554 = vmatprep.subr.bf16.mxu1 %v1619_v27 }
 0x104   :  { %1533 = vmatpush3.bf16.msra.mxu0 %v1620_v28  ;;  %1555 = vmatpush3.bf16.msra.mxu1 %v1621_v29 }
 0x105   :  { %v577_v36 = vpop.f32.mrf.mxu0  ;;  %1534 = vmatprep.subr.bf16.mxu0 %v1622_v30  ;;  %v620_v41 = vpop.f32.mrf.mxu1  ;;  %1556 = vmatprep.subr.bf16.mxu1 %v1623_v32 }
 0x106   :  { %v578_v55 = vadd.f32 %v577_v36, %v110_v43  ;;  %v621_v59 = vadd.f32 %v620_v41, %v118_v46 }
 0x107   :  { %v579_v44 = vpop.f32.mrf.mxu0  ;;  %v622_v47 = vpop.f32.mrf.mxu1 }
 0x108   :  { %1535 = vmatpush3.bf16.msra.mxu0 %v1624_v35  ;;  %1557 = vmatpush3.bf16.msra.mxu1 %v1625_v38  ;;  %v580_v52 = vadd.f32 %v579_v44, %v114_v42  ;;  %v623_v56 = vadd.f32 %v622_v47, %v122_v45  ;;  %v633_v6 = vmax.f32 %v578_v55, 0.0  ;;  %v635_v10 = vmax.f32 %v621_v59, 0.0 }
 0x109   :  { %v581_v49 = vpop.f32.mrf.mxu0  ;;  %1536 = vmatprep.subr.bf16.mxu0 %v1626_v39  ;;  %v624_v40 = vpop.f32.mrf.mxu1  ;;  %1558 = vmatprep.subr.bf16.mxu1 %v1627_v37 }
 0x10a   :  { %v582_v53 = vadd.f32 %v581_v49, %v110_v43  ;;  %v625_v57 = vadd.f32 %v624_v40, %v118_v46  ;;  %v634_v2 = vmax.f32 %v580_v52, 0.0  ;;  %v636_v8 = vmax.f32 %v623_v56, 0.0 }
 0x10b   :  { %v583_v58 = vpop.f32.mrf.mxu0  ;;  %v626_v61 = vpop.f32.mrf.mxu1 }
 0x10c   :  { %v584_v60 = vadd.f32 %v583_v58, %v114_v42  ;;  %1537 = vmatpush3.bf16.msra.mxu0 %v1628_v48  ;;  %v641_v63 = vmax.f32 %v582_v53, 0.0  ;;  %v627_v0 = vadd.f32 %v626_v61, %v122_v45  ;;  %1559 = vmatpush3.bf16.msra.mxu1 %v1629_v50  ;;  %v643_v4 = vmax.f32 %v625_v57, 0.0 }
 0x10d   :  { %1538 = vmatprep.subr.bf16.mxu0 %v1630_v51  ;;  %1560 = vmatprep.subr.bf16.mxu1 %v1631_v54 }
 0x10e   :  { %v642_v5 = vmax.f32 %v584_v60, 0.0  ;;  %v644_v9 = vmax.f32 %v627_v0, 0.0  ;;  %v649_v12 = vpack.c.bf16 %v641_v63, %v633_v6  ;;  %v651_v14 = vpack.c.bf16 %v643_v4, %v635_v10 }
 0x110   :  { %v650_v11 = vpack.c.bf16 %v642_v5, %v634_v2  ;;  %1539 = vmatpush3.bf16.msra.mxu0 %v1632_v62  ;;  %v652_v13 = vpack.c.bf16 %v644_v9, %v636_v8  ;;  %1561 = vmatpush3.bf16.msra.mxu1 %v1633_v1 }
 0x112   :  { %1286 = vmatprep.mubr.bf16.mxu0 %v650_v11  ;;  %1327 = vmatprep.mubr.bf16.mxu1 %v652_v13 }
 0x113   :  { %1287 = vmatmul.mubr.bf16.vlgmr.msra.gmra.mxu0 %v649_v12  ;;  %1328 = vmatmul.mubr.bf16.vlgmr.msra.gmra.mxu1 %v651_v14 }
 0x1b3   :  { %v1496_v15 = vpop.f32.mrf.mxu0  ;;  %v1518_v7 = vpop.f32.mrf.mxu1 }
 0x1b5   :  { %v1497_v16 = vpop.f32.mrf.mxu0  ;;  %v1519_v17 = vpop.f32.mrf.mxu1 }
 0x1b6   :  { %v1498_v19 = vadd.f32 %v1497_v16, %v1496_v15  ;;  %v1520_v27 = vadd.f32 %v1519_v17, %v1518_v7 }
 0x1b7   :  { %v1499_v18 = vpop.f32.mrf.mxu0  ;;  %v1521_v20 = vpop.f32.mrf.mxu1 }
 0x1b8   :  { %v1207_v23 = vadd.f32 %v1498_v19, %v1415_v21 }
 0x1b9   :  { %v1500_v22 = vpop.f32.mrf.mxu0  ;;  %v1522_v25 = vpop.f32.mrf.mxu1 }
 0x1ba   :  { %v1501_v24 = vadd.f32 %v1500_v22, %v1499_v18  ;;  %v1248_v30 = vadd.f32 %v1520_v27, %v1207_v23  ;;  %v1523_v3 = vadd.f32 %v1522_v25, %v1521_v20 }
 0x1bc   :  { %v1210_v31 = vadd.f32 %v1501_v24, %v1415_v21 }
 0x1be   :  { %v1251_v41 = vadd.f32 %v1523_v3, %v1210_v31 }
 0x1d3   :  { %v1540_v26 = vpop.f32.mrf.mxu0  ;;  %v1562_v28 = vpop.f32.mrf.mxu1 }
 0x1d5   :  { %v1541_v29 = vpop.f32.mrf.mxu0  ;;  %v1563_v33 = vpop.f32.mrf.mxu1 }
 0x1d6   :  { %v1542_v32 = vadd.f32 %v1541_v29, %v1540_v26  ;;  %v1564_v36 = vadd.f32 %v1563_v33, %v1562_v28 }
 0x1d7   :  { %v1543_v34 = vpop.f32.mrf.mxu0  ;;  %v1565_v38 = vpop.f32.mrf.mxu1 }
 0x1d8   :  { %v1289_v35 = vadd.f32 %v1542_v32, %v1248_v30 }
 0x1d9   :  { %v1544_v39 = vpop.f32.mrf.mxu0  ;;  %v1566_v43 = vpop.f32.mrf.mxu1 }
 0x1da   :  { %v1330_v42 = vadd.f32 %v1564_v36, %v1289_v35  ;;  %v1545_v37 = vadd.f32 %v1544_v39, %v1543_v34  ;;  %v1567_v46 = vadd.f32 %v1566_v43, %v1565_v38 }
 0x1dc   :  { %1336 = vst [vmem:[%s2110_s5] sm:$0xff] %v1330_v42  ;;  %v1338_v44 = vmax.f32 %v1330_v42, 0.0  ;;  %v1292_v45 = vadd.f32 %v1545_v37, %v1251_v41 }
 0x1de   :  { %1340 = vst [vmem:[%s2111_s6] sm:$0xff] %v1338_v44  ;;  %v1333_v47 = vadd.f32 %v1567_v46, %v1292_v45 }
 0x1e0   :  { %1337 = vst [vmem:[%s2110_s5 + $0x8] sm:$0xff] %v1333_v47  ;;  %v1339_v48 = vmax.f32 %v1333_v47, 0.0 }
 0x1e2   :  { %1341 = vst [vmem:[%s2111_s6 + $0x8] sm:$0xff] %v1339_v48 }

</bundles_post_ra>
